<compile_context>
chip_gen: v7x
topology: tpu7x:2x2x1
jax: 0.10.0
libtpu: 0.0.40
codegen_flags: <defaults>
</compile_context>

<pallas_src>
import jax
import jax.numpy as jnp
from jax.experimental import pallas as pl
from jax.experimental.pallas import tpu as pltpu

IN_F = 84       # nn.Linear in_features
OUT_F = 20      # nn.Linear out_features
OUT_PAD = 128   # lane-dense padded output width
DEFAULT_TB = 1024  # batch tile (rows per grid step)


def _round_up(n, m):
    return ((n + m - 1) // m) * m


def output_kernel(x_ref, wt_ref, b_ref, o_ref):
    # MXU matmul with f32 accumulation: (TB, 84) @ (84, 128) -> (TB, 128).
    logits = jnp.dot(x_ref[...], wt_ref[...], preferred_element_type=jnp.float32)
    logits = logits + b_ref[...]                  # (1, 128) broadcasts over rows
    # Numerically stable log-softmax over the last (lane) dim. Padded lanes
    # carry bias = -1e30, so exp(shifted) underflows to 0 there and the
    # normalizer only sees the 20 real classes.
    m = jnp.max(logits, axis=-1, keepdims=True)
    shifted = logits - m
    lse = jnp.log(jnp.sum(jnp.exp(shifted), axis=-1, keepdims=True))
    o_ref[...] = (shifted - lse).astype(o_ref.dtype)


def prepare_params(weight, bias):
    """One-time parameter prep (do at init, NOT per forward call).

    weight: (20, 84) PyTorch layout; bias: (20,).
    Returns wt_pad (84, 128) with zero columns for padded classes and
    b_pad (1, 128) with -1e30 in padded classes (kills them in the softmax).
    Requires f32/bf16 params (fp16 would overflow -1e30 to -inf; still correct
    but asserted against to keep behavior explicit).
    """
    assert weight.dtype in (jnp.float32, jnp.bfloat16)
    wt_pad = jnp.zeros((IN_F, OUT_PAD), weight.dtype).at[:, :OUT_F].set(weight.T)
    b_pad = jnp.full((1, OUT_PAD), -1e30, bias.dtype).at[0, :OUT_F].set(bias)
    return wt_pad, b_pad


def output_forward(x, wt_pad, b_pad, *, block_b=DEFAULT_TB, return_padded=False):
    """x: (B, 84) f32; wt_pad: (84, 128); b_pad: (1, 128).

    Returns (B, 20) by default (matches the PyTorch module). With
    return_padded=True returns (B, 128) where lanes 20..127 are ~-1e30 and
    must be treated as masked by the consumer (saves the slice's extra HBM
    round-trip when fusing with argmax / NLL downstream).
    """
    B = x.shape[0]
    # Batch tile: multiple of the f32 sublane (8), capped at block_b.
    tb = min(block_b, _round_up(B, 8))
    Bp = _round_up(B, tb)
    if Bp != B:
        x = jnp.pad(x, ((0, Bp - B), (0, 0)))   # zero rows -> finite output, sliced off
    grid = (Bp // tb,)

    itemsize = jnp.dtype(x.dtype).itemsize
    cost = pl.CostEstimate(
        flops=2 * Bp * IN_F * OUT_PAD,
        transcendentals=Bp * (OUT_PAD + 1),      # exp over all 128 lanes + log per row
        bytes_accessed=(x.size + wt_pad.size + b_pad.size) * itemsize
        + Bp * OUT_PAD * itemsize,
    )

    out_padded = pl.pallas_call(
        output_kernel,
        out_shape=jax.ShapeDtypeStruct((Bp, OUT_PAD), x.dtype),
        grid_spec=pltpu.PrefetchScalarGridSpec(
            num_scalar_prefetch=0,
            grid=grid,
            in_specs=[
                pl.BlockSpec((tb, IN_F), lambda i: (i, 0)),        # x tile, pipelined
                pl.BlockSpec((IN_F, OUT_PAD), lambda i: (0, 0)),   # weight, resident
                pl.BlockSpec((1, OUT_PAD), lambda i: (0, 0)),      # bias, resident
            ],
            out_specs=pl.BlockSpec((tb, OUT_PAD), lambda i: (i, 0)),
        ),
        compiler_params=pltpu.CompilerParams(
            dimension_semantics=("parallel",),   # shard batch across v7x's 2 TCs
        ),
        cost_estimate=cost,
    )(x, wt_pad, b_pad)

    if return_padded:
        return out_padded[:B]
    return out_padded[:B, :OUT_F]


if __name__ == "__main__":
    key = jax.random.PRNGKey(0)
    kx, kw, kb = jax.random.split(key, 3)

    B = 8
    # Deterministic synthetic parameters (PyTorch-default-style uniform init).
    bound = 1.0 / (IN_F ** 0.5)
    weight = jax.random.uniform(kw, (OUT_F, IN_F), jnp.float32, -bound, bound)
    bias = jax.random.uniform(kb, (OUT_F,), jnp.float32, -bound, bound)
    x = jax.random.normal(kx, (B, IN_F), jnp.float32)

    wt_pad, b_pad = prepare_params(weight, bias)   # one-time prep
    out = output_forward(x, wt_pad, b_pad)
    jax.block_until_ready(out)

    # Cross-check against plain JAX reference of the PyTorch module.
    ref = jax.nn.log_softmax(x @ weight.T + bias, axis=-1)
    assert out.shape == (B, OUT_F)
    assert jnp.allclose(out, ref, atol=1e-5, rtol=1e-5)

    # Also exercise a ragged, multi-tile batch path (B not multiple of tile).
    B2 = 300
    x2 = jax.random.normal(kx, (B2, IN_F), jnp.float32)
    out2 = output_forward(x2, wt_pad, b_pad, block_b=128)
    jax.block_until_ready(out2)
    ref2 = jax.nn.log_softmax(x2 @ weight.T + bias, axis=-1)
    assert out2.shape == (B2, OUT_F)
    assert jnp.allclose(out2, ref2, atol=1e-5, rtol=1e-5)

    print("KERNEL_OK")
</pallas_src>

<mosaic_0001>
module attributes {stable_mosaic.version = 11 : i64} {
  func.func @output_kernel(%arg0: i32, %arg1: memref<8x84xf32, #tpu.memory_space<vmem>>, %arg2: memref<84x128xf32, #tpu.memory_space<vmem>>, %arg3: memref<1x128xf32, #tpu.memory_space<vmem>>, %arg4: memref<8x128xf32, #tpu.memory_space<vmem>>) attributes {dimension_semantics = [#tpu.dimension_semantics<parallel>], iteration_bounds = array<i64: 1>, scalar_prefetch = 0 : i64, scratch_operands = 0 : i64, tpu.core_type = #tpu.core_type<tc>, window_params = [{transform_indices = @transform_0, window_bounds = array<i64: 8, 84>}, {pipeline_mode = #tpu.pipeline_mode<synchronous>, transform_indices = @transform_1, window_bounds = array<i64: 84, 128>}, {pipeline_mode = #tpu.pipeline_mode<synchronous>, transform_indices = @transform_2, window_bounds = array<i64: 1, 128>}, {transform_indices = @transform_3, window_bounds = array<i64: 8, 128>}]} {
    %c0 = arith.constant 0 : index
    %c0_0 = arith.constant 0 : index
    %0 = vector.load %arg1[%c0, %c0_0] : memref<8x84xf32, #tpu.memory_space<vmem>>, vector<8x84xf32>
    %c0_1 = arith.constant 0 : index
    %c0_2 = arith.constant 0 : index
    %1 = vector.load %arg2[%c0_1, %c0_2] : memref<84x128xf32, #tpu.memory_space<vmem>>, vector<84x128xf32>
    %cst = arith.constant dense<0.000000e+00> : vector<8x128xf32>
    %2 = tpu.matmul %0, %1, %cst {dimension_numbers = #tpu.dot_dimension_numbers<[1], [0], [0], [1], [0, 0, 1, 1], [], []>} : vector<8x84xf32>, vector<84x128xf32>, vector<8x128xf32> -> vector<8x128xf32>
    %c0_3 = arith.constant 0 : index
    %c0_4 = arith.constant 0 : index
    %3 = vector.load %arg3[%c0_3, %c0_4] : memref<1x128xf32, #tpu.memory_space<vmem>>, vector<1x128xf32>
    %4 = vector.broadcast %3 : vector<1x128xf32> to vector<8x128xf32>
    %5 = arith.addf %2, %4 : vector<8x128xf32>
    %cst_5 = arith.constant dense<0xFF800000> : vector<8xf32>
    %6 = vector.multi_reduction <maximumf>, %5, %cst_5 [1] : vector<8x128xf32> to vector<8xf32>
    %7 = vector.shape_cast %6 : vector<8xf32> to vector<8x1xf32>
    %8 = vector.broadcast %7 : vector<8x1xf32> to vector<8x128xf32>
    %9 = arith.subf %5, %8 : vector<8x128xf32>
    %10 = math.exp %9 : vector<8x128xf32>
    %cst_6 = arith.constant dense<0.000000e+00> : vector<8xf32>
    %11 = vector.multi_reduction <add>, %10, %cst_6 [1] : vector<8x128xf32> to vector<8xf32>
    %12 = vector.shape_cast %11 : vector<8xf32> to vector<8x1xf32>
    %13 = math.log %12 : vector<8x1xf32>
    %14 = vector.broadcast %13 : vector<8x1xf32> to vector<8x128xf32>
    %15 = arith.subf %9, %14 : vector<8x128xf32>
    %c0_7 = arith.constant 0 : index
    %c0_8 = arith.constant 0 : index
    %16 = vector.load %arg4[%c0_7, %c0_8] : memref<8x128xf32, #tpu.memory_space<vmem>>, vector<8x128xf32>
    tpu.vector_store %arg4[%c0_7, %c0_8], %15 {strides = array<i32>} : memref<8x128xf32, #tpu.memory_space<vmem>>, vector<8x128xf32>,
    return
  }
  func.func @transform_0(%arg0: i32) -> (i32, i32) {
    %c0_i32 = arith.constant 0 : i32
    %c0_i32_0 = arith.constant 0 : i32
    return %arg0, %c0_i32 : i32, i32
  }
  func.func @transform_1(%arg0: i32) -> (i32, i32) {
    %c0_i32 = arith.constant 0 : i32
    %c0_i32_0 = arith.constant 0 : i32
    %c0_i32_1 = arith.constant 0 : i32
    return %c0_i32, %c0_i32_0 : i32, i32
  }
  func.func @transform_2(%arg0: i32) -> (i32, i32) {
    %c0_i32 = arith.constant 0 : i32
    %c0_i32_0 = arith.constant 0 : i32
    %c0_i32_1 = arith.constant 0 : i32
    return %c0_i32, %c0_i32_0 : i32, i32
  }
  func.func @transform_3(%arg0: i32) -> (i32, i32) {
    %c0_i32 = arith.constant 0 : i32
    %c0_i32_0 = arith.constant 0 : i32
    return %arg0, %c0_i32 : i32, i32
  }
}

</mosaic_0001>

<bundles_post_ra>
// kernel: tpu_custom_call.1
= control target key start
LH: loop header
LB: loop body
LE: loop exit
PB: predicated region body
PF: predicated region fallthrough
CT: control target
= control target key end

     0   :  { %8 = vsyncpa [#allocation3], 0  ;;  %s378_s0 = inlined_call_operand.hbm [shape: f32[8,84], index: 0, kind: input, shape index: {}]   ;;  %s379_s1 = inlined_call_operand.hbm [shape: f32[84,128], index: 1, kind: input, shape index: {}]   ;;  %s380_s2 = inlined_call_operand.vmem [shape: f32[1,128], index: 2, kind: input, shape index: {}]   ;;  %s381_s3 = inlined_call_operand.hbm [shape: f32[8,128], index: 3, kind: output, shape index: {}]  }
   0x1   :  { %9 = vsyncpa [#allocation6], 0 }
   0x2   :  { %10 = vsyncpa [#allocation4], 0  ;;  %s304_s12 = smov [#allocation2]   ;;  %s305_s14 = smov [#allocation5]  }
   0x3   :  { %s17_s13 = sshll.u32 %s304_s12, 4  ;;  %s26_s15 = sshll.u32 %s305_s14, 4  ;;  %s18_s13 = int_to_ptr.vmem [resolvable:$true] %s17_s13  ;;  %s332_s15 = int_to_ptr.vmem [resolvable:$true] %s26_s15 }
   0x4   :  { %s232_s18 = scalar_lea.hbm %s378_s0, 128 }
   0x5   :  { %p233_p0 = scmp.ne.s32.totalorder %s378_s0, %s232_s18  ;;  %p236_p1 = scmp.lt.u32.totalorder %s232_s18, %s378_s0 }
   0x7   :  { %p238_p2 = pnand %p236_p1, %p233_p0 }
   0x9   :  { %241 = shalt.err (!%p238_p2)
}
   0xa   :  { %s242_s23 = scalar_lea.vmem %s18_s13, 128  ;;  %p247_p4 = scmp.lt.s32.totalorder %s18_s13, %s18_s13 }
   0xb   :  { %p243_p3 = scmp.ne.s32.totalorder %s18_s13, %s242_s23  ;;  %p248_p5 = scmp.lt.s32.totalorder %s242_s23, %s242_s23 }
   0xd   :  { %p249_p6 = por %p248_p5, %p247_p4 }
   0xf   :  { %p250_p7 = pnand %p249_p6, %p243_p3 }
  0x11   :  { %253 = shalt.err (!%p250_p7)
}
  0x12   :  { %20 = dma.hbm_to_vmem [thread:$0]  %s378_s0, 128, %s18_s13, [#allocation3]  }
  0x13   :  { %s254_s28 = scalar_lea.hbm %s379_s1, 1408 }
  0x14   :  { %p255_p8 = scmp.ne.s32.totalorder %s379_s1, %s254_s28  ;;  %p258_p9 = scmp.lt.u32.totalorder %s254_s28, %s379_s1 }
  0x16   :  { %p260_p10 = pnand %p258_p9, %p255_p8 }
  0x18   :  { %263 = shalt.err (!%p260_p10)
}
  0x19   :  { %s264_s6 = scalar_lea.vmem %s332_s15, 1408  ;;  %p269_p12 = scmp.lt.s32.totalorder %s332_s15, %s332_s15 }
  0x1a   :  { %p265_p11 = scmp.ne.s32.totalorder %s332_s15, %s264_s6  ;;  %p270_p13 = scmp.lt.s32.totalorder %s264_s6, %s264_s6 }
  0x1c   :  { %p271_p0 = por %p270_p13, %p269_p12 }
  0x1e   :  { %p272_p1 = pnand %p271_p0, %p265_p11 }
  0x20   :  { %275 = shalt.err (!%p272_p1)
}
  0x21   :  { %s306_s0 = smov 128   ;;  %s307_s7 = smov 8  }
  0x22   :  { %32 = dma.hbm_to_vmem [thread:$0]  %s379_s1, 1408, %s332_s15, [#allocation6], %s306_s0, %s306_s0, %s307_s7  }
  0x23   :  { %298 = dma.done.wait [#allocation3], 128  }
  0x24   :  { %299 = vsyncadd [#allocation3], 4294967168 }
  0x25   :  { %300 = dma.done.wait [#allocation6], 1408  }
  0x26   :  { %301 = vsyncadd [#allocation6], 4294965888  ;;  %v308_v0 = vmov 0.0|0.0   ;;  %vm309_vm0 = vmmov 0   ;;  %v310_v1 = vmov 0.0   ;;  %v42_v2 = vld [vmem:[#allocation5] sm:$0xff] }
  0x27   :  { %205 = vmatprep.subr.bf16.mxu0 %v308_v0  ;;  %202 = vmatprep.mubr.msk.f32.mxu0 %vm309_vm0, %v310_v1  ;;  %v43_v3 = vld [vmem:[#allocation5 + $0x8] sm:$0xff]  ;;  %v44_v4 = vld [vmem:[#allocation5 + $0x10] sm:$0xff]  ;;  %v45_v6 = vld [vmem:[#allocation5 + $0x18] sm:$0xff]  ;;  %vm64_vm1 = vcmask 1043456   ;;  %vm60_vm2 = vcmask 687104   ;;  %s311_s11 = smov [#allocation7]  }
  0x28   :  { %v206_v5 = vpack.c.bf16 %v43_v3, %v42_v2  ;;  %v209_v7 = vpack.c.bf16 %v45_v6, %v44_v4  ;;  %v46_v8 = vld [vmem:[#allocation5 + $0x20] sm:$0xff]  ;;  %v47_v9 = vld [vmem:[#allocation5 + $0x28] sm:$0xff]  ;;  %v48_v11 = vld [vmem:[#allocation5 + $0x30] sm:$0xff]  ;;  %s155_s12 = sshll.u32 %s311_s11, 4  ;;  %s156_s12 = int_to_ptr.vmem [resolvable:$true] %s155_s12 }
  0x29   :  { %v212_v10 = vpack.c.bf16 %v47_v9, %v46_v8  ;;  %v49_v12 = vld [vmem:[#allocation5 + $0x38] sm:$0xff]  ;;  %v50_v14 = vld [vmem:[#allocation5 + $0x40] sm:$0xff]  ;;  %v51_v15 = vld [vmem:[#allocation5 + $0x48] sm:$0xff]  ;;  %p281_p3 = scmp.lt.s32.totalorder %s156_s12, %s156_s12 }
  0x2a   :  { %207 = vmatpush3.bf16.msra.mxu0 %v206_v5  ;;  %v215_v13 = vpack.c.bf16 %v49_v12, %v48_v11  ;;  %v218_v16 = vpack.c.bf16 %v51_v15, %v50_v14  ;;  %v52_v17 = vld [vmem:[#allocation5 + $0x50] sm:$0xf]  ;;  %v41_v18 = vld [vmem:[#allocation2] sm:$0xff] }
  0x2b   :  { %208 = vmatprep.subr.bf16.mxu0 %v308_v0  ;;  %v165_v19 = vld [vmem:[%s380_s2] ss:$0 sm:$0xff]  ;;  %s276_s2 = scalar_lea.vmem %s156_s12, 128 }
  0x2c   :  { %p277_p2 = scmp.ne.s32.totalorder %s156_s12, %s276_s2  ;;  %p282_p4 = scmp.lt.s32.totalorder %s276_s2, %s276_s2 }
  0x2e   :  { %210 = vmatpush3.bf16.msra.mxu0 %v209_v7  ;;  %p283_p5 = por %p282_p4, %p281_p3 }
  0x2f   :  { %211 = vmatprep.subr.bf16.mxu0 %v308_v0 }
  0x30   :  { %p284_p6 = pnand %p283_p5, %p277_p2 }
  0x32   :  { %213 = vmatpush3.bf16.msra.mxu0 %v212_v10 }
  0x33   :  { %214 = vmatprep.subr.bf16.mxu0 %v308_v0 }
  0x36   :  { %216 = vmatpush3.bf16.msra.mxu0 %v215_v13 }
  0x37   :  { %217 = vmatprep.subr.bf16.mxu0 %v308_v0 }
  0x3a   :  { %219 = vmatpush3.bf16.msra.mxu0 %v218_v16 }
  0x3b   :  { %200 = vmatprep.subr.mxu0 %v310_v1 }
  0x3e   :  { %201 = vmatpush3.msk.msra.mxu0 %vm64_vm1, %v52_v17 }
  0x3f   :  { %203 = vmatmul.mubr.msk.f32.vlgmr.msra.gmra.mrb[0].mxu0 %vm60_vm2, %v41_v18 }
 0x112   :  { %v134_v20 = vpop.f32.mrb[0].mxu0 }
 0x113   :  { %v135_v21 = vadd.f32 %v165_v19, %v134_v20  ;;  %v204_v22 = vpop.f32.mrb[1].mxu0 }
 0x115   :  { %138 = vmax.xlane.f32.xlu0 %v135_v21 }
 0x1a2   :  { %v139_v23 = vpop.xlane.xlu0 %138 }
 0x1a3   :  { %v140_v24 = vsub.f32 %v135_v21, %v139_v23 }
 0x1a5   :  { %v141_v25 = vmul.f32 1.442695, %v140_v24 }
 0x1a7   :  { %228 = vpow2.f32 %v141_v25 }
 0x1b1   :  { %v229_v26 = vpop.eup %228 }
 0x1b2   :  { %143 = vadd.xlane.f32.xlu0 %v229_v26 }
 0x23f   :  { %v144_v27 = vpop.xlane.xlu0 %143 }
 0x240   :  { %230 = vlog2.f32 %v144_v27 }
 0x24a   :  { %v231_v28 = vpop.eup %230 }
 0x24b   :  { %v146_v29 = vmul.f32 0.6931472, %v231_v28 }
 0x24d   :  { %v147_v30 = vsub.f32 %v140_v24, %v146_v29 }
 0x24f   :  { %148 = vst [vmem:[#allocation7] sm:$0xff] %v147_v30 }
 0x250   :  { %287 = shalt.err (!%p284_p6)
}
 0x251   :  { %s288_s15 = scalar_lea.hbm %s381_s3, 128 }
 0x252   :  { %p289_p7 = scmp.ne.s32.totalorder %s381_s3, %s288_s15  ;;  %p292_p8 = scmp.lt.u32.totalorder %s288_s15, %s381_s3 }
 0x254   :  { %p294_p9 = pnand %p292_p8, %p289_p7 }
 0x256   :  { %297 = shalt.err (!%p294_p9)
}
 0x257   :  { %158 = dma.vmem_to_hbm [thread:$0]  %s156_s12, 128, %s381_s3, [#allocation4]  }
 0x258   :  { %302 = dma.done.wait [#allocation4], 128  }
 0x259   :  { %303 = vsyncadd [#allocation4], 4294967168 }
 0x25a   :  { %162 = vsyncpa [#allocation3], 1 }
 0x25b   :  { %163 = vsyncpa [#allocation6], 1 }
 0x25c   :  { %164 = vsyncpa [#allocation4], 1 }

</bundles_post_ra>
